<compile_context>
chip_gen: v5e
topology: v5e:2x2
jax: 0.10.0
libtpu: 0.0.40
codegen_flags: <defaults>
</compile_context>

<pallas_src>
import functools

import jax
import jax.numpy as jnp
from jax.experimental import pallas as pl
from jax.experimental.pallas import tpu as pltpu

FEATURE_DIM = 2048   # resnet152 fc.in_features
LANE = 128
BATCH_ALIGN = 16     # bf16 sublane packing => keep batch tiles multiples of 16


def _round_up(x, m):
    return (x + m - 1) // m * m


def encoder_final_kernel(x_ref, w_ref, scale_ref, shift_ref, o_ref):
    """One batch tile of: out = (x @ W) * scale + shift  (Linear + eval BN fused).

    x_ref     : (TB, D)  bf16   flattened backbone features (tiled over batch)
    w_ref     : (D, Lp)  bf16   VMEM-resident across the batch grid
    scale_ref : (1, Lp)  f32    gamma / sqrt(running_var + eps)
    shift_ref : (1, Lp)  f32    (linear_bias - running_mean) * scale + beta
    o_ref     : (TB, Lp) f32    lane-dense (Lp = latent_dim rounded up to 128)
    """
    acc = jnp.dot(x_ref[...], w_ref[...], preferred_element_type=jnp.float32)
    o_ref[...] = acc * scale_ref[...] + shift_ref[...]


def fold_final_params(w, b, gamma, beta, running_mean, running_var, eps=1e-5):
    """Fold Linear bias + eval-mode BatchNorm1d into (W_bf16, scale, shift).

    w is (D, L) in x @ W layout. Done once, outside the jitted forward, so no
    per-call padding / scatter ops remain on the latency-critical path.
    """
    D, L = w.shape
    inv_std = 1.0 / jnp.sqrt(running_var.astype(jnp.float32) + eps)
    scale = gamma.astype(jnp.float32) * inv_std                               # (L,)
    shift = (b.astype(jnp.float32) - running_mean.astype(jnp.float32)) * scale \
        + beta.astype(jnp.float32)                                            # (L,)

    Lp = _round_up(L, LANE)  # lane-dense output store
    w_p = jnp.zeros((D, Lp), jnp.float32).at[:, :L].set(w).astype(jnp.bfloat16)
    scale_p = jnp.zeros((1, Lp), jnp.float32).at[0, :L].set(scale)
    shift_p = jnp.zeros((1, Lp), jnp.float32).at[0, :L].set(shift)
    return w_p, scale_p, shift_p


@functools.partial(jax.jit, static_argnames=("latent_dim", "block_b"))
def encoder_forward(features, w_p, scale_p, shift_p, *, latent_dim, block_b=256):
    """features: (B, C, H, W) output of the (untranslated) resnet152 backbone."""
    B = features.shape[0]
    x = features.reshape(B, -1).astype(jnp.bfloat16)   # == x.view(x.size(0), -1)
    D = x.shape[1]
    Lp = w_p.shape[1]

    # Batch tile: 256 fills the 2x256 MXU on v6e/v7x (pass block_b=128 on v5e).
    TB = min(block_b, _round_up(B, BATCH_ALIGN))
    Bp = _round_up(B, TB)
    if Bp != B:
        x = jnp.pad(x, ((0, Bp - B), (0, 0)))

    # VMEM budget: resident weights + folded params + double-buffered (TB, D)
    # activation tiles + double-buffered (TB, Lp) output tiles, 2x headroom,
    # clamped to a v7x-safe 48 MiB (v7x physical VMEM is only 64 MiB).
    resident = w_p.size * 2 + (scale_p.size + shift_p.size) * 4
    per_tile = 2 * (TB * D * 2 + TB * Lp * 4)
    vmem_limit = int(min(48 * 1024 * 1024,
                         max(16 * 1024 * 1024, 2 * (resident + per_tile))))

    out = pl.pallas_call(
        encoder_final_kernel,
        out_shape=jax.ShapeDtypeStruct((Bp, Lp), jnp.float32),
        grid_spec=pltpu.PrefetchScalarGridSpec(
            num_scalar_prefetch=0,
            grid=(Bp // TB,),
            in_specs=[
                pl.BlockSpec((TB, D), lambda i: (i, 0)),   # activations: batch-tiled
                pl.BlockSpec((D, Lp), lambda i: (0, 0)),   # weights: VMEM-resident
                pl.BlockSpec((1, Lp), lambda i: (0, 0)),   # scale: resident
                pl.BlockSpec((1, Lp), lambda i: (0, 0)),   # shift: resident
            ],
            out_specs=pl.BlockSpec((TB, Lp), lambda i: (i, 0)),
        ),
        compiler_params=pltpu.CompilerParams(
            dimension_semantics=("parallel",),  # megacore-shard batch tiles (v7x)
            vmem_limit_bytes=vmem_limit,
        ),
    )(x, w_p, scale_p, shift_p)

    return out[:B, :latent_dim]


def init_encoder_final_params(key, in_features, latent_dim):
    """PyTorch-default Linear init + non-trivial BN running stats / affine."""
    kw, kb, kg, kbeta, km, kv = jax.random.split(key, 6)
    bound = 1.0 / jnp.sqrt(in_features)
    w = jax.random.uniform(kw, (in_features, latent_dim), jnp.float32, -bound, bound)
    b = jax.random.uniform(kb, (latent_dim,), jnp.float32, -bound, bound)
    gamma = jax.random.uniform(kg, (latent_dim,), jnp.float32, 0.8, 1.2)
    beta = 0.1 * jax.random.normal(kbeta, (latent_dim,), jnp.float32)
    mean = 0.1 * jax.random.normal(km, (latent_dim,), jnp.float32)
    var = jax.random.uniform(kv, (latent_dim,), jnp.float32, 0.5, 1.5)
    return w, b, gamma, beta, mean, var


def reference_forward(features, w, b, gamma, beta, mean, var, eps=1e-5):
    x = features.reshape(features.shape[0], -1).astype(jnp.float32)
    y = x @ w + b
    y = (y - mean) / jnp.sqrt(var + eps)
    return gamma * y + beta


if __name__ == "__main__":
    key = jax.random.PRNGKey(0)
    k_feat, k_params = jax.random.split(key)

    B, LATENT = 2, 128
    # (B, 2048, 1, 1): the shape the frozen resnet152 backbone would emit.
    features = jax.random.normal(k_feat, (B, FEATURE_DIM, 1, 1), jnp.float32)

    w, b, gamma, beta, mean, var = init_encoder_final_params(
        k_params, FEATURE_DIM, LATENT)
    w_p, scale_p, shift_p = fold_final_params(w, b, gamma, beta, mean, var)

    out = encoder_forward(features, w_p, scale_p, shift_p, latent_dim=LATENT)
    out = jax.block_until_ready(out)

    ref = reference_forward(features, w, b, gamma, beta, mean, var)
    assert out.shape == (B, LATENT), out.shape
    # bf16 inputs / f32 accumulation -> loose tolerance vs. full-f32 reference.
    assert jnp.allclose(out, ref, atol=3e-2, rtol=3e-2), \
        float(jnp.max(jnp.abs(out - ref)))

    print("KERNEL_OK")
</pallas_src>

<mosaic_0001>
module attributes {stable_mosaic.version = 11 : i64} {
  func.func @encoder_final_kernel(%arg0: i32, %arg1: memref<16x2048xbf16, #tpu.memory_space<vmem>>, %arg2: memref<2048x128xbf16, #tpu.memory_space<vmem>>, %arg3: memref<1x128xf32, #tpu.memory_space<vmem>>, %arg4: memref<1x128xf32, #tpu.memory_space<vmem>>, %arg5: memref<16x128xf32, #tpu.memory_space<vmem>>) attributes {dimension_semantics = [#tpu.dimension_semantics<parallel>], iteration_bounds = array<i64: 1>, scalar_prefetch = 0 : i64, scratch_operands = 0 : i64, tpu.core_type = #tpu.core_type<tc>, window_params = [{transform_indices = @transform_0, window_bounds = array<i64: 16, 2048>}, {pipeline_mode = #tpu.pipeline_mode<synchronous>, transform_indices = @transform_1, window_bounds = array<i64: 2048, 128>}, {pipeline_mode = #tpu.pipeline_mode<synchronous>, transform_indices = @transform_2, window_bounds = array<i64: 1, 128>}, {pipeline_mode = #tpu.pipeline_mode<synchronous>, transform_indices = @transform_3, window_bounds = array<i64: 1, 128>}, {transform_indices = @transform_4, window_bounds = array<i64: 16, 128>}]} {
    %c0 = arith.constant 0 : index
    %c0_0 = arith.constant 0 : index
    %0 = vector.load %arg1[%c0, %c0_0] : memref<16x2048xbf16, #tpu.memory_space<vmem>>, vector<16x2048xbf16>
    %c0_1 = arith.constant 0 : index
    %c0_2 = arith.constant 0 : index
    %1 = vector.load %arg2[%c0_1, %c0_2] : memref<2048x128xbf16, #tpu.memory_space<vmem>>, vector<2048x128xbf16>
    %cst = arith.constant dense<0.000000e+00> : vector<16x128xf32>
    %2 = tpu.matmul %0, %1, %cst {dimension_numbers = #tpu.dot_dimension_numbers<[1], [0], [0], [1], [0, 0, 1, 1], [], []>} : vector<16x2048xbf16>, vector<2048x128xbf16>, vector<16x128xf32> -> vector<16x128xf32>
    %c0_3 = arith.constant 0 : index
    %c0_4 = arith.constant 0 : index
    %3 = vector.load %arg3[%c0_3, %c0_4] : memref<1x128xf32, #tpu.memory_space<vmem>>, vector<1x128xf32>
    %4 = vector.broadcast %3 : vector<1x128xf32> to vector<16x128xf32>
    %5 = arith.mulf %2, %4 : vector<16x128xf32>
    %c0_5 = arith.constant 0 : index
    %c0_6 = arith.constant 0 : index
    %6 = vector.load %arg4[%c0_5, %c0_6] : memref<1x128xf32, #tpu.memory_space<vmem>>, vector<1x128xf32>
    %7 = vector.broadcast %6 : vector<1x128xf32> to vector<16x128xf32>
    %8 = arith.addf %5, %7 : vector<16x128xf32>
    %c0_7 = arith.constant 0 : index
    %c0_8 = arith.constant 0 : index
    %9 = vector.load %arg5[%c0_7, %c0_8] : memref<16x128xf32, #tpu.memory_space<vmem>>, vector<16x128xf32>
    tpu.vector_store %arg5[%c0_7, %c0_8], %8 {strides = array<i32>} : memref<16x128xf32, #tpu.memory_space<vmem>>, vector<16x128xf32>,
    return
  }
  func.func @transform_0(%arg0: i32) -> (i32, i32) {
    %c0_i32 = arith.constant 0 : i32
    %c0_i32_0 = arith.constant 0 : i32
    return %arg0, %c0_i32 : i32, i32
  }
  func.func @transform_1(%arg0: i32) -> (i32, i32) {
    %c0_i32 = arith.constant 0 : i32
    %c0_i32_0 = arith.constant 0 : i32
    %c0_i32_1 = arith.constant 0 : i32
    return %c0_i32, %c0_i32_0 : i32, i32
  }
  func.func @transform_2(%arg0: i32) -> (i32, i32) {
    %c0_i32 = arith.constant 0 : i32
    %c0_i32_0 = arith.constant 0 : i32
    %c0_i32_1 = arith.constant 0 : i32
    return %c0_i32, %c0_i32_0 : i32, i32
  }
  func.func @transform_3(%arg0: i32) -> (i32, i32) {
    %c0_i32 = arith.constant 0 : i32
    %c0_i32_0 = arith.constant 0 : i32
    %c0_i32_1 = arith.constant 0 : i32
    return %c0_i32, %c0_i32_0 : i32, i32
  }
  func.func @transform_4(%arg0: i32) -> (i32, i32) {
    %c0_i32 = arith.constant 0 : i32
    %c0_i32_0 = arith.constant 0 : i32
    return %arg0, %c0_i32 : i32, i32
  }
}

</mosaic_0001>

<bundles_post_ra>
// kernel: encoder_forward.1
= control target key start
LH: loop header
LB: loop body
LE: loop exit
PB: predicated region body
PF: predicated region fallthrough
CT: control target
= control target key end

     0   :  { %9 = vsyncpa [#allocation3], 0  ;;  %s2147_s18 = smov [#allocation2]   ;;  %s2148_s20 = smov 64   ;;  %s2286_s0 = inlined_call_operand.vmem [shape: bf16[16,2048], index: 0, kind: input, shape index: {}]   ;;  %s2287_s1 = inlined_call_operand.hbm [shape: bf16[2048,128], index: 1, kind: input, shape index: {}]   ;;  %s2288_s2 = inlined_call_operand.vmem [shape: f32[1,128], index: 2, kind: input, shape index: {}]   ;;  %s2289_s3 = inlined_call_operand.vmem [shape: f32[1,128], index: 3, kind: input, shape index: {}]   ;;  %s2290_s4 = inlined_call_operand.vmem [shape: f32[16,128], index: 4, kind: output, shape index: {}]  }
   0x1   :  { %s16_s17 = sshll.u32 %s2287_s1, 4  ;;  %s18_s19 = sshll.u32 %s2147_s18, 4  ;;  %s17_s17 = int_to_ptr.hbm [resolvable:$true] %s16_s17  ;;  %s19_s19 = int_to_ptr.vmem [resolvable:$true] %s18_s19 }
   0x2   :  { %s2149_s21 = smov 4  }
   0x3   :  { %24 = dma.hbm_to_vmem [thread:$0]  %s17_s17, 16384, %s19_s19, [#allocation3], %s2148_s20, %s2148_s20, %s2149_s21  }
   0x4   :  { %2145 = dma.done.wait [#allocation3], 16384  }
   0x5   :  { %2146 = vsyncadd [#allocation3], 4294950912  ;;  %v1995_v0 = vld [vmem:[#allocation2 + $0x38] sm:$0xff]  ;;  %v1994_v4 = vld [vmem:[#allocation2 + $0x30] sm:$0xff] }
   0x6   :  { %v2003_v1 = vld [vmem:[#allocation2 + $0x78] sm:$0xff]  ;;  %1153 = vmatpush.bf16.msra.mxu0 %v1995_v0  ;;  %v2002_v5 = vld [vmem:[#allocation2 + $0x70] sm:$0xff]  ;;  %v1993_v8 = vld [vmem:[#allocation2 + $0x28] sm:$0xff] }
   0x7   :  { %v2011_v2 = vld [vmem:[#allocation2 + $0xb8] sm:$0xff]  ;;  %1167 = vmatpush.bf16.msra.mxu1 %v2003_v1  ;;  %v2010_v6 = vld [vmem:[#allocation2 + $0xb0] sm:$0xff]  ;;  %v2001_v9 = vld [vmem:[#allocation2 + $0x68] sm:$0xff] }
   0x8   :  { %v2019_v3 = vld [vmem:[#allocation2 + $0xf8] sm:$0xff]  ;;  %1181 = vmatpush.bf16.msra.mxu2 %v2011_v2  ;;  %v2018_v7 = vld [vmem:[#allocation2 + $0xf0] sm:$0xff]  ;;  %v2009_v10 = vld [vmem:[#allocation2 + $0xa8] sm:$0xff] }
   0x9   :  { %1195 = vmatpush.bf16.msra.mxu3 %v2019_v3  ;;  %v2017_v11 = vld [vmem:[#allocation2 + $0xe8] sm:$0xff]  ;;  %v1992_v12 = vld [vmem:[#allocation2 + $0x20] sm:$0xff]  ;;  %v1991_v16 = vld [vmem:[#allocation2 + $0x18] sm:$0xff] }
   0xa   :  { %1154 = vmatpush.bf16.msra.mxu0 %v1994_v4  ;;  %v2000_v13 = vld [vmem:[#allocation2 + $0x60] sm:$0xff]  ;;  %v1999_v17 = vld [vmem:[#allocation2 + $0x58] sm:$0xff]  ;;  %v1990_v20 = vld [vmem:[#allocation2 + $0x10] sm:$0xff] }
   0xb   :  { %1168 = vmatpush.bf16.msra.mxu1 %v2002_v5  ;;  %v2008_v14 = vld [vmem:[#allocation2 + $0xa0] sm:$0xff]  ;;  %v2007_v18 = vld [vmem:[#allocation2 + $0x98] sm:$0xff]  ;;  %v1998_v21 = vld [vmem:[#allocation2 + $0x50] sm:$0xff] }
   0xc   :  { %1182 = vmatpush.bf16.msra.mxu2 %v2010_v6  ;;  %v2016_v15 = vld [vmem:[#allocation2 + $0xe0] sm:$0xff]  ;;  %v2015_v19 = vld [vmem:[#allocation2 + $0xd8] sm:$0xff]  ;;  %v2006_v22 = vld [vmem:[#allocation2 + $0x90] sm:$0xff] }
   0xd   :  { %1196 = vmatpush.bf16.msra.mxu3 %v2018_v7  ;;  %v2014_v23 = vld [vmem:[#allocation2 + $0xd0] sm:$0xff]  ;;  %v1989_v24 = vld [vmem:[#allocation2 + $0x8] sm:$0xff]  ;;  %v1988_v28 = vld [vmem:[#allocation2] sm:$0xff] }
   0xe   :  { %1155 = vmatpush.bf16.msra.mxu0 %v1993_v8  ;;  %v1997_v25 = vld [vmem:[#allocation2 + $0x48] sm:$0xff]  ;;  %v1996_v29 = vld [vmem:[#allocation2 + $0x40] sm:$0xff]  ;;  %v2027_v32 = vld [vmem:[#allocation2 + $0x138] sm:$0xff] }
   0xf   :  { %1169 = vmatpush.bf16.msra.mxu1 %v2001_v9  ;;  %v2005_v26 = vld [vmem:[#allocation2 + $0x88] sm:$0xff]  ;;  %v2004_v30 = vld [vmem:[#allocation2 + $0x80] sm:$0xff]  ;;  %v2035_v33 = vld [vmem:[#allocation2 + $0x178] sm:$0xff] }
  0x10   :  { %1183 = vmatpush.bf16.msra.mxu2 %v2009_v10  ;;  %v2013_v27 = vld [vmem:[#allocation2 + $0xc8] sm:$0xff]  ;;  %v2012_v31 = vld [vmem:[#allocation2 + $0xc0] sm:$0xff]  ;;  %v2043_v42 = vld [vmem:[#allocation2 + $0x1b8] sm:$0xff] }
  0x11   :  { %1197 = vmatpush.bf16.msra.mxu3 %v2017_v11  ;;  %v1398_v34 = vld [vmem:[%s2286_s0] sm:$0xf]  ;;  %v1406_v36 = vld [vmem:[%s2286_s0 + $0x8] sm:$0xf]  ;;  %v1972_v38 = vld [vmem:[%s2286_s0 + $0x4] sm:$0xf] }
  0x12   :  { %1156 = vmatpush.bf16.msra.mxu0 %v1992_v12  ;;  %v1980_v35 = vld [vmem:[%s2286_s0 + $0x3c] sm:$0xf0]  ;;  %v1981_v37 = vld [vmem:[%s2286_s0 + $0x44] sm:$0xf0]  ;;  %v1400_v39 = vld [vmem:[%s2286_s0 + $0x40] sm:$0xf0] }
  0x13   :  { %1170 = vmatpush.bf16.msra.mxu1 %v2000_v13  ;;  %v1973_v40 = vld [vmem:[%s2286_s0 + $0xc] sm:$0xf]  ;;  %v2051_v43 = vld [vmem:[#allocation2 + $0x1f8] sm:$0xff]  ;;  %v1399_v44 = vor.u32 %v1980_v35, %v1398_v34  ;;  %v1407_v45 = vor.u32 %v1981_v37, %v1406_v36  ;;  %v1403_v46 = vor.u32 %v1972_v38, %v1400_v39  ;;  %v2026_v48 = vld [vmem:[#allocation2 + $0x130] sm:$0xff] }
  0x14   :  { %1184 = vmatpush.bf16.msra.mxu2 %v2008_v14  ;;  %v1408_v41 = vld [vmem:[%s2286_s0 + $0x48] sm:$0xf0]  ;;  %v2034_v49 = vld [vmem:[#allocation2 + $0x170] sm:$0xff]  ;;  %v2024_v56 = vld [vmem:[#allocation2 + $0x120] sm:$0xff] }
  0x15   :  { %1198 = vmatpush.bf16.msra.mxu3 %v2016_v15  ;;  %v1411_v47 = vor.u32 %v1973_v40, %v1408_v41  ;;  %v2042_v50 = vld [vmem:[#allocation2 + $0x1b0] sm:$0xff]  ;;  %v2025_v52 = vld [vmem:[#allocation2 + $0x128] sm:$0xff]  ;;  %v2032_v57 = vld [vmem:[#allocation2 + $0x160] sm:$0xff] }
  0x16   :  { %1157 = vmatpush.bf16.msra.mxu0 %v1991_v16  ;;  %v2050_v51 = vld [vmem:[#allocation2 + $0x1f0] sm:$0xff]  ;;  %v2033_v53 = vld [vmem:[#allocation2 + $0x168] sm:$0xff]  ;;  %v2040_v58 = vld [vmem:[#allocation2 + $0x1a0] sm:$0xff] }
  0x17   :  { %1171 = vmatpush.bf16.msra.mxu1 %v1999_v17  ;;  %v2041_v54 = vld [vmem:[#allocation2 + $0x1a8] sm:$0xff]  ;;  %v2048_v59 = vld [vmem:[#allocation2 + $0x1e0] sm:$0xff]  ;;  %v2023_v60 = vld [vmem:[#allocation2 + $0x118] sm:$0xff] }
  0x18   :  { %1185 = vmatpush.bf16.msra.mxu2 %v2007_v18  ;;  %v2049_v55 = vld [vmem:[#allocation2 + $0x1e8] sm:$0xff]  ;;  %v2031_v61 = vld [vmem:[#allocation2 + $0x158] sm:$0xff]  ;;  %v2022_v0 = vld [vmem:[#allocation2 + $0x110] sm:$0xff] }
  0x19   :  { %1199 = vmatpush.bf16.msra.mxu3 %v2015_v19  ;;  %v2039_v62 = vld [vmem:[#allocation2 + $0x198] sm:$0xff]  ;;  %v2030_v1 = vld [vmem:[#allocation2 + $0x150] sm:$0xff]  ;;  %v2021_v4 = vld [vmem:[#allocation2 + $0x108] sm:$0xff] }
  0x1a   :  { %1158 = vmatpush.bf16.msra.mxu0 %v1990_v20  ;;  %v2047_v63 = vld [vmem:[#allocation2 + $0x1d8] sm:$0xff]  ;;  %v2038_v2 = vld [vmem:[#allocation2 + $0x190] sm:$0xff]  ;;  %v2029_v5 = vld [vmem:[#allocation2 + $0x148] sm:$0xff] }
  0x1b   :  { %1172 = vmatpush.bf16.msra.mxu1 %v1998_v21  ;;  %v2046_v3 = vld [vmem:[#allocation2 + $0x1d0] sm:$0xff]  ;;  %v2037_v6 = vld [vmem:[#allocation2 + $0x188] sm:$0xff]  ;;  %v2020_v8 = vld [vmem:[#allocation2 + $0x100] sm:$0xff] }
  0x1c   :  { %1186 = vmatpush.bf16.msra.mxu2 %v2006_v22  ;;  %v2045_v7 = vld [vmem:[#allocation2 + $0x1c8] sm:$0xff]  ;;  %v2028_v9 = vld [vmem:[#allocation2 + $0x140] sm:$0xff]  ;;  %v2059_v12 = vld [vmem:[#allocation2 + $0x238] sm:$0xff] }
  0x1d   :  { %1200 = vmatpush.bf16.msra.mxu3 %v2014_v23  ;;  %v2036_v10 = vld [vmem:[#allocation2 + $0x180] sm:$0xff]  ;;  %v2067_v13 = vld [vmem:[#allocation2 + $0x278] sm:$0xff]  ;;  %v1414_v14 = vld [vmem:[%s2286_s0 + $0x10] sm:$0xf] }
  0x1e   :  { %1159 = vmatpush.bf16.msra.mxu0 %v1989_v24  ;;  %v2044_v11 = vld [vmem:[#allocation2 + $0x1c0] sm:$0xff]  ;;  %v1982_v15 = vld [vmem:[%s2286_s0 + $0x4c] sm:$0xf0]  ;;  %v1422_v16 = vld [vmem:[%s2286_s0 + $0x18] sm:$0xf] }
  0x1f   :  { %1173 = vmatpush.bf16.msra.mxu1 %v1997_v25  ;;  %v1983_v17 = vld [vmem:[%s2286_s0 + $0x54] sm:$0xf0]  ;;  %v1974_v18 = vld [vmem:[%s2286_s0 + $0x14] sm:$0xf]  ;;  %v1975_v20 = vld [vmem:[%s2286_s0 + $0x1c] sm:$0xf]  ;;  %v1415_v24 = vor.u32 %v1982_v15, %v1414_v14 }
  0x20   :  { %1187 = vmatpush.bf16.msra.mxu2 %v2005_v26  ;;  %v1416_v19 = vld [vmem:[%s2286_s0 + $0x50] sm:$0xf0]  ;;  %v1424_v21 = vld [vmem:[%s2286_s0 + $0x58] sm:$0xf0]  ;;  %v1423_v25 = vor.u32 %v1983_v17, %v1422_v16  ;;  %v2073_v34 = vld [vmem:[#allocation2 + $0x2a8] sm:$0xff] }
  0x21   :  { %1201 = vmatpush.bf16.msra.mxu3 %v2013_v27  ;;  %v2075_v22 = vld [vmem:[#allocation2 + $0x2b8] sm:$0xff]  ;;  %v1419_v26 = vor.u32 %v1974_v18, %v1416_v19  ;;  %v1427_v27 = vor.u32 %v1975_v20, %v1424_v21  ;;  %v2081_v35 = vld [vmem:[#allocation2 + $0x2e8] sm:$0xff]  ;;  %v2056_v36 = vld [vmem:[#allocation2 + $0x220] sm:$0xff] }
  0x22   :  { %1160 = vmatpush.bf16.msra.mxu0 %v1988_v28  ;;  %v2083_v23 = vld [vmem:[#allocation2 + $0x2f8] sm:$0xff]  ;;  %v2058_v28 = vld [vmem:[#allocation2 + $0x230] sm:$0xff]  ;;  %v2064_v37 = vld [vmem:[#allocation2 + $0x260] sm:$0xff] }
  0x23   :  { %1174 = vmatpush.bf16.msra.mxu1 %v1996_v29  ;;  %v2066_v29 = vld [vmem:[#allocation2 + $0x270] sm:$0xff]  ;;  %v2072_v38 = vld [vmem:[#allocation2 + $0x2a0] sm:$0xff]  ;;  %v2055_v40 = vld [vmem:[#allocation2 + $0x218] sm:$0xff] }
  0x24   :  { %1188 = vmatpush.bf16.msra.mxu2 %v2004_v30  ;;  %v2074_v30 = vld [vmem:[#allocation2 + $0x2b0] sm:$0xff]  ;;  %v2080_v39 = vld [vmem:[#allocation2 + $0x2e0] sm:$0xff]  ;;  %v2063_v41 = vld [vmem:[#allocation2 + $0x258] sm:$0xff] }
  0x25   :  { %1202 = vmatpush.bf16.msra.mxu3 %v2012_v31  ;;  %1161 = vmatmul.bf16.vlgmr.msra.gmra.mxu0 %v1399_v44  ;;  %v2082_v31 = vld [vmem:[#allocation2 + $0x2f0] sm:$0xff]  ;;  %v2105_v14 = vld [vmem:[#allocation2 + $0x3a8] sm:$0xff]  ;;  %v2088_v16 = vld [vmem:[#allocation2 + $0x320] sm:$0xff] }
  0x26   :  { %1209 = vmatpush.bf16.msrb.mxu0 %v2027_v32  ;;  %1175 = vmatmul.bf16.vlgmr.msra.gmra.mxu1 %v1403_v46  ;;  %v2057_v32 = vld [vmem:[#allocation2 + $0x228] sm:$0xff]  ;;  %v2054_v44 = vld [vmem:[#allocation2 + $0x210] sm:$0xff]  ;;  %v2096_v17 = vld [vmem:[#allocation2 + $0x360] sm:$0xff] }
  0x27   :  { %1223 = vmatpush.bf16.msrb.mxu1 %v2035_v33  ;;  %1189 = vmatmul.bf16.vlgmr.msra.gmra.mxu2 %v1407_v45  ;;  %v2065_v33 = vld [vmem:[#allocation2 + $0x268] sm:$0xff]  ;;  %v2062_v45 = vld [vmem:[#allocation2 + $0x250] sm:$0xff]  ;;  %v2104_v18 = vld [vmem:[#allocation2 + $0x3a0] sm:$0xff] }
  0x28   :  { %1237 = vmatpush.bf16.msrb.mxu2 %v2043_v42  ;;  %1203 = vmatmul.bf16.vlgmr.msra.gmra.mxu3 %v1411_v47  ;;  %v2071_v42 = vld [vmem:[#allocation2 + $0x298] sm:$0xff]  ;;  %v2070_v46 = vld [vmem:[#allocation2 + $0x290] sm:$0xff]  ;;  %v2113_v15 = vld [vmem:[#allocation2 + $0x3e8] sm:$0xff] }
  0x29   :  { %1251 = vmatpush.bf16.msrb.mxu3 %v2051_v43  ;;  %v2079_v43 = vld [vmem:[#allocation2 + $0x2d8] sm:$0xff]  ;;  %v2078_v47 = vld [vmem:[#allocation2 + $0x2d0] sm:$0xff]  ;;  %v2112_v19 = vld [vmem:[#allocation2 + $0x3e0] sm:$0xff] }
  0x2a   :  { %1210 = vmatpush.bf16.msrb.mxu0 %v2026_v48  ;;  %v2053_v48 = vld [vmem:[#allocation2 + $0x208] sm:$0xff]  ;;  %v2087_v20 = vld [vmem:[#allocation2 + $0x318] sm:$0xff] }
  0x2b   :  { %1224 = vmatpush.bf16.msrb.mxu1 %v2034_v49  ;;  %v2061_v49 = vld [vmem:[#allocation2 + $0x248] sm:$0xff]  ;;  %v2095_v21 = vld [vmem:[#allocation2 + $0x358] sm:$0xff] }
  0x2c   :  { %1238 = vmatpush.bf16.msrb.mxu2 %v2042_v50  ;;  %v2069_v50 = vld [vmem:[#allocation2 + $0x288] sm:$0xff] }
  0x2d   :  { %1252 = vmatpush.bf16.msrb.mxu3 %v2050_v51  ;;  %v2077_v51 = vld [vmem:[#allocation2 + $0x2c8] sm:$0xff] }
  0x2e   :  { %1211 = vmatpush.bf16.msrb.mxu0 %v2025_v52  ;;  %v2052_v52 = vld [vmem:[#allocation2 + $0x200] sm:$0xff] }
  0x2f   :  { %1225 = vmatpush.bf16.msrb.mxu1 %v2033_v53  ;;  %v2060_v53 = vld [vmem:[#allocation2 + $0x240] sm:$0xff] }
  0x30   :  { %1239 = vmatpush.bf16.msrb.mxu2 %v2041_v54  ;;  %v2068_v54 = vld [vmem:[#allocation2 + $0x280] sm:$0xff] }
  0x31   :  { %1253 = vmatpush.bf16.msrb.mxu3 %v2049_v55  ;;  %v2076_v55 = vld [vmem:[#allocation2 + $0x2c0] sm:$0xff] }
  0x32   :  { %1212 = vmatpush.bf16.msrb.mxu0 %v2024_v56  ;;  %v2091_v56 = vld [vmem:[#allocation2 + $0x338] sm:$0xff] }
  0x33   :  { %1226 = vmatpush.bf16.msrb.mxu1 %v2032_v57  ;;  %v2099_v57 = vld [vmem:[#allocation2 + $0x378] sm:$0xff] }
  0x34   :  { %1240 = vmatpush.bf16.msrb.mxu2 %v2040_v58  ;;  %v1430_v58 = vld [vmem:[%s2286_s0 + $0x20] sm:$0xf] }
  0x35   :  { %1254 = vmatpush.bf16.msrb.mxu3 %v2048_v59  ;;  %v1984_v59 = vld [vmem:[%s2286_s0 + $0x5c] sm:$0xf0] }
  0x36   :  { %1213 = vmatpush.bf16.msrb.mxu0 %v2023_v60  ;;  %v1438_v60 = vld [vmem:[%s2286_s0 + $0x28] sm:$0xf] }
  0x37   :  { %1227 = vmatpush.bf16.msrb.mxu1 %v2031_v61  ;;  %v1985_v61 = vld [vmem:[%s2286_s0 + $0x64] sm:$0xf0] }
  0x38   :  { %1241 = vmatpush.bf16.msrb.mxu2 %v2039_v62  ;;  %v1976_v62 = vld [vmem:[%s2286_s0 + $0x24] sm:$0xf] }
  0x39   :  { %1255 = vmatpush.bf16.msrb.mxu3 %v2047_v63  ;;  %v1432_v63 = vld [vmem:[%s2286_s0 + $0x60] sm:$0xf0] }
  0x3a   :  { %1214 = vmatpush.bf16.msrb.mxu0 %v2022_v0  ;;  %v1977_v0 = vld [vmem:[%s2286_s0 + $0x2c] sm:$0xf] }
  0x3b   :  { %1228 = vmatpush.bf16.msrb.mxu1 %v2030_v1  ;;  %v1440_v1 = vld [vmem:[%s2286_s0 + $0x68] sm:$0xf0] }
  0x3c   :  { %1242 = vmatpush.bf16.msrb.mxu2 %v2038_v2  ;;  %v2107_v2 = vld [vmem:[#allocation2 + $0x3b8] sm:$0xff] }
  0x3d   :  { %1256 = vmatpush.bf16.msrb.mxu3 %v2046_v3  ;;  %v2115_v3 = vld [vmem:[#allocation2 + $0x3f8] sm:$0xff] }
  0x3e   :  { %1215 = vmatpush.bf16.msrb.mxu0 %v2021_v4  ;;  %v1431_v4 = vor.u32 %v1984_v59, %v1430_v58 }
  0x3f   :  { %1229 = vmatpush.bf16.msrb.mxu1 %v2029_v5  ;;  %v1439_v5 = vor.u32 %v1985_v61, %v1438_v60 }
  0x40   :  { %1243 = vmatpush.bf16.msrb.mxu2 %v2037_v6  ;;  %v1435_v6 = vor.u32 %v1976_v62, %v1432_v63 }
  0x41   :  { %1257 = vmatpush.bf16.msrb.mxu3 %v2045_v7  ;;  %v1443_v7 = vor.u32 %v1977_v0, %v1440_v1 }
  0x42   :  { %1216 = vmatpush.bf16.msrb.mxu0 %v2020_v8  ;;  %v2090_v8 = vld [vmem:[#allocation2 + $0x330] sm:$0xff] }
  0x43   :  { %1230 = vmatpush.bf16.msrb.mxu1 %v2028_v9  ;;  %v2098_v9 = vld [vmem:[#allocation2 + $0x370] sm:$0xff] }
  0x44   :  { %1244 = vmatpush.bf16.msrb.mxu2 %v2036_v10  ;;  %v2106_v10 = vld [vmem:[#allocation2 + $0x3b0] sm:$0xff] }
  0x45   :  { %1258 = vmatpush.bf16.msrb.mxu3 %v2044_v11  ;;  %1217 = vmatmul.bf16.vlgmr.msrb.gmra.mxu0 %v1415_v24  ;;  %v2114_v11 = vld [vmem:[#allocation2 + $0x3f0] sm:$0xff] }
  0x46   :  { %1265 = vmatpush.bf16.msra.mxu0 %v2059_v12  ;;  %1231 = vmatmul.bf16.vlgmr.msrb.gmra.mxu1 %v1419_v26  ;;  %v2089_v12 = vld [vmem:[#allocation2 + $0x328] sm:$0xff]  ;;  %v2086_v24 = vld [vmem:[#allocation2 + $0x310] sm:$0xff] }
  0x47   :  { %1279 = vmatpush.bf16.msra.mxu1 %v2067_v13  ;;  %1245 = vmatmul.bf16.vlgmr.msrb.gmra.mxu2 %v1423_v25  ;;  %v2097_v13 = vld [vmem:[#allocation2 + $0x368] sm:$0xff]  ;;  %v2094_v25 = vld [vmem:[#allocation2 + $0x350] sm:$0xff] }
  0x48   :  { %1293 = vmatpush.bf16.msra.mxu2 %v2075_v22  ;;  %1259 = vmatmul.bf16.vlgmr.msrb.gmra.mxu3 %v1427_v27  ;;  %v2103_v22 = vld [vmem:[#allocation2 + $0x398] sm:$0xff]  ;;  %v2102_v26 = vld [vmem:[#allocation2 + $0x390] sm:$0xff] }
  0x49   :  { %1307 = vmatpush.bf16.msra.mxu3 %v2083_v23  ;;  %v2111_v23 = vld [vmem:[#allocation2 + $0x3d8] sm:$0xff]  ;;  %v2110_v27 = vld [vmem:[#allocation2 + $0x3d0] sm:$0xff] }
  0x4a   :  { %1266 = vmatpush.bf16.msra.mxu0 %v2058_v28  ;;  %v2085_v28 = vld [vmem:[#allocation2 + $0x308] sm:$0xff] }
  0x4b   :  { %1280 = vmatpush.bf16.msra.mxu1 %v2066_v29  ;;  %v2093_v29 = vld [vmem:[#allocation2 + $0x348] sm:$0xff] }
  0x4c   :  { %1294 = vmatpush.bf16.msra.mxu2 %v2074_v30  ;;  %v2101_v30 = vld [vmem:[#allocation2 + $0x388] sm:$0xff] }
  0x4d   :  { %1308 = vmatpush.bf16.msra.mxu3 %v2082_v31  ;;  %v2109_v31 = vld [vmem:[#allocation2 + $0x3c8] sm:$0xff] }
  0x4e   :  { %1267 = vmatpush.bf16.msra.mxu0 %v2057_v32  ;;  %v2084_v32 = vld [vmem:[#allocation2 + $0x300] sm:$0xff] }
  0x4f   :  { %1281 = vmatpush.bf16.msra.mxu1 %v2065_v33  ;;  %v2092_v33 = vld [vmem:[#allocation2 + $0x340] sm:$0xff] }
  0x50   :  { %1295 = vmatpush.bf16.msra.mxu2 %v2073_v34  ;;  %v2100_v34 = vld [vmem:[#allocation2 + $0x380] sm:$0xff] }
  0x51   :  { %1309 = vmatpush.bf16.msra.mxu3 %v2081_v35  ;;  %v2108_v35 = vld [vmem:[#allocation2 + $0x3c0] sm:$0xff] }
  0x52   :  { %1268 = vmatpush.bf16.msra.mxu0 %v2056_v36  ;;  %v1446_v36 = vld [vmem:[%s2286_s0 + $0x30] sm:$0xf] }
  0x53   :  { %1282 = vmatpush.bf16.msra.mxu1 %v2064_v37  ;;  %v1986_v37 = vld [vmem:[%s2286_s0 + $0x6c] sm:$0xf0] }
  0x54   :  { %1296 = vmatpush.bf16.msra.mxu2 %v2072_v38  ;;  %v1978_v38 = vld [vmem:[%s2286_s0 + $0x34] sm:$0xf] }
  0x55   :  { %1310 = vmatpush.bf16.msra.mxu3 %v2080_v39  ;;  %v1448_v39 = vld [vmem:[%s2286_s0 + $0x70] sm:$0xf0] }
  0x56   :  { %1269 = vmatpush.bf16.msra.mxu0 %v2055_v40  ;;  %v1454_v40 = vld [vmem:[%s2286_s0 + $0x38] sm:$0xf] }
  0x57   :  { %1283 = vmatpush.bf16.msra.mxu1 %v2063_v41  ;;  %v1987_v41 = vld [vmem:[%s2286_s0 + $0x74] sm:$0xf0] }
  0x58   :  { %1297 = vmatpush.bf16.msra.mxu2 %v2071_v42  ;;  %v1979_v42 = vld [vmem:[%s2286_s0 + $0x3c] sm:$0xf] }
  0x59   :  { %1311 = vmatpush.bf16.msra.mxu3 %v2079_v43  ;;  %v1456_v43 = vld [vmem:[%s2286_s0 + $0x78] sm:$0xf0] }
  0x5a   :  { %1270 = vmatpush.bf16.msra.mxu0 %v2054_v44  ;;  %v1447_v44 = vor.u32 %v1986_v37, %v1446_v36  ;;  %v2119_v37 = vld [vmem:[%s2288_s2] ss:$0 sm:$0xff] }
  0x5b   :  { %1284 = vmatpush.bf16.msra.mxu1 %v2062_v45  ;;  %v1451_v45 = vor.u32 %v1978_v38, %v1448_v39 }
  0x5c   :  { %1298 = vmatpush.bf16.msra.mxu2 %v2070_v46  ;;  %v1455_v46 = vor.u32 %v1987_v41, %v1454_v40  ;;  %v2120_v40 = vld [vmem:[%s2289_s3] ss:$0 sm:$0xff] }
  0x5d   :  { %1312 = vmatpush.bf16.msra.mxu3 %v2078_v47  ;;  %v1459_v47 = vor.u32 %v1979_v42, %v1456_v43 }
  0x5e   :  { %1271 = vmatpush.bf16.msra.mxu0 %v2053_v48 }
  0x5f   :  { %1285 = vmatpush.bf16.msra.mxu1 %v2061_v49 }
  0x60   :  { %1299 = vmatpush.bf16.msra.mxu2 %v2069_v50 }
  0x61   :  { %1313 = vmatpush.bf16.msra.mxu3 %v2077_v51 }
  0x62   :  { %1272 = vmatpush.bf16.msra.mxu0 %v2052_v52 }
  0x63   :  { %1286 = vmatpush.bf16.msra.mxu1 %v2060_v53 }
  0x64   :  { %1300 = vmatpush.bf16.msra.mxu2 %v2068_v54 }
  0x65   :  { %1314 = vmatpush.bf16.msra.mxu3 %v2076_v55  ;;  %1273 = vmatmul.bf16.vlgmr.msra.gmra.mxu0 %v1431_v4 }
  0x66   :  { %1321 = vmatpush.bf16.msrb.mxu0 %v2091_v56  ;;  %1287 = vmatmul.bf16.vlgmr.msra.gmra.mxu1 %v1435_v6 }
  0x67   :  { %1335 = vmatpush.bf16.msrb.mxu1 %v2099_v57  ;;  %1301 = vmatmul.bf16.vlgmr.msra.gmra.mxu2 %v1439_v5 }
  0x68   :  { %1349 = vmatpush.bf16.msrb.mxu2 %v2107_v2  ;;  %1315 = vmatmul.bf16.vlgmr.msra.gmra.mxu3 %v1443_v7 }
  0x69   :  { %1363 = vmatpush.bf16.msrb.mxu3 %v2115_v3 }
  0x6a   :  { %1322 = vmatpush.bf16.msrb.mxu0 %v2090_v8 }
  0x6b   :  { %1336 = vmatpush.bf16.msrb.mxu1 %v2098_v9 }
  0x6c   :  { %1350 = vmatpush.bf16.msrb.mxu2 %v2106_v10 }
  0x6d   :  { %1364 = vmatpush.bf16.msrb.mxu3 %v2114_v11 }
  0x6e   :  { %1323 = vmatpush.bf16.msrb.mxu0 %v2089_v12 }
  0x6f   :  { %1337 = vmatpush.bf16.msrb.mxu1 %v2097_v13 }
  0x70   :  { %1351 = vmatpush.bf16.msrb.mxu2 %v2105_v14 }
  0x71   :  { %1365 = vmatpush.bf16.msrb.mxu3 %v2113_v15 }
  0x72   :  { %1324 = vmatpush.bf16.msrb.mxu0 %v2088_v16 }
  0x73   :  { %1338 = vmatpush.bf16.msrb.mxu1 %v2096_v17 }
  0x74   :  { %1352 = vmatpush.bf16.msrb.mxu2 %v2104_v18 }
  0x75   :  { %1366 = vmatpush.bf16.msrb.mxu3 %v2112_v19 }
  0x76   :  { %1325 = vmatpush.bf16.msrb.mxu0 %v2087_v20 }
  0x77   :  { %1339 = vmatpush.bf16.msrb.mxu1 %v2095_v21 }
  0x78   :  { %1353 = vmatpush.bf16.msrb.mxu2 %v2103_v22 }
  0x79   :  { %1367 = vmatpush.bf16.msrb.mxu3 %v2111_v23 }
  0x7a   :  { %1326 = vmatpush.bf16.msrb.mxu0 %v2086_v24 }
  0x7b   :  { %1340 = vmatpush.bf16.msrb.mxu1 %v2094_v25 }
  0x7c   :  { %1354 = vmatpush.bf16.msrb.mxu2 %v2102_v26 }
  0x7d   :  { %1368 = vmatpush.bf16.msrb.mxu3 %v2110_v27 }
  0x7e   :  { %1327 = vmatpush.bf16.msrb.mxu0 %v2085_v28 }
  0x7f   :  { %1341 = vmatpush.bf16.msrb.mxu1 %v2093_v29 }
  0x80   :  { %1355 = vmatpush.bf16.msrb.mxu2 %v2101_v30 }
  0x81   :  { %1369 = vmatpush.bf16.msrb.mxu3 %v2109_v31 }
  0x82   :  { %1328 = vmatpush.bf16.msrb.mxu0 %v2084_v32 }
  0x83   :  { %1342 = vmatpush.bf16.msrb.mxu1 %v2092_v33 }
  0x84   :  { %1356 = vmatpush.bf16.msrb.mxu2 %v2100_v34 }
  0x85   :  { %1370 = vmatpush.bf16.msrb.mxu3 %v2108_v35  ;;  %1329 = vmatmul.bf16.vlgmr.msrb.gmra.mxu0 %v1447_v44 }
  0x86   :  { %1343 = vmatmul.bf16.vlgmr.msrb.gmra.mxu1 %v1451_v45 }
  0x87   :  { %1357 = vmatmul.bf16.vlgmr.msrb.gmra.mxu2 %v1455_v46 }
  0x88   :  { %1371 = vmatmul.bf16.vlgmr.msrb.gmra.mxu3 %v1459_v47 }
  0xa2   :  { %v1162_v48 = vpop.f32.mrf.mxu0 }
  0xa3   :  { %v1176_v49 = vpop.f32.mrf.mxu1 }
  0xa4   :  { %v1177_v56 = vadd.f32 %v1176_v49, %v1162_v48 }
  0xaa   :  { %v1190_v50 = vpop.f32.mrf.mxu2  ;;  %v1164_v52 = vpop.f32.mrf.mxu0 }
  0xab   :  { %v1204_v51 = vpop.f32.mrf.mxu3  ;;  %v1178_v53 = vpop.f32.mrf.mxu1  ;;  %v1191_v59 = vadd.f32 %v1190_v50, %v1177_v56 }
  0xac   :  { %v1179_v0 = vadd.f32 %v1178_v53, %v1164_v52 }
  0xad   :  { %v1205_v62 = vadd.f32 %v1204_v51, %v1191_v59 }
  0xb2   :  { %v1192_v54 = vpop.f32.mrf.mxu2 }
  0xb3   :  { %v1206_v55 = vpop.f32.mrf.mxu3  ;;  %v1193_v3 = vadd.f32 %v1192_v54, %v1179_v0 }
  0xb5   :  { %v1207_v8 = vadd.f32 %v1206_v55, %v1193_v3 }
  0xc2   :  { %v1218_v57 = vpop.f32.mrf.mxu0 }
  0xc3   :  { %v1232_v58 = vpop.f32.mrf.mxu1  ;;  %v1219_v1 = vadd.f32 %v1218_v57, %v1205_v62 }
  0xc5   :  { %v1233_v4 = vadd.f32 %v1232_v58, %v1219_v1 }
  0xca   :  { %v1246_v60 = vpop.f32.mrf.mxu2  ;;  %v1220_v63 = vpop.f32.mrf.mxu0 }
  0xcb   :  { %v1260_v61 = vpop.f32.mrf.mxu3  ;;  %v1234_v2 = vpop.f32.mrf.mxu1  ;;  %v1247_v9 = vadd.f32 %v1246_v60, %v1233_v4  ;;  %v1221_v11 = vadd.f32 %v1220_v63, %v1207_v8 }
  0xcd   :  { %v1261_v12 = vadd.f32 %v1260_v61, %v1247_v9  ;;  %v1235_v15 = vadd.f32 %v1234_v2, %v1221_v11 }
  0xd2   :  { %v1248_v5 = vpop.f32.mrf.mxu2 }
  0xd3   :  { %v1262_v6 = vpop.f32.mrf.mxu3  ;;  %v1249_v17 = vadd.f32 %v1248_v5, %v1235_v15 }
  0xd5   :  { %v1263_v21 = vadd.f32 %v1262_v6, %v1249_v17 }
  0xe2   :  { %v1274_v7 = vpop.f32.mrf.mxu0 }
  0xe3   :  { %v1288_v10 = vpop.f32.mrf.mxu1  ;;  %v1275_v16 = vadd.f32 %v1274_v7, %v1261_v12 }
  0xe5   :  { %v1289_v19 = vadd.f32 %v1288_v10, %v1275_v16 }
  0xea   :  { %v1302_v13 = vpop.f32.mrf.mxu2  ;;  %v1276_v18 = vpop.f32.mrf.mxu0 }
  0xeb   :  { %v1316_v14 = vpop.f32.mrf.mxu3  ;;  %v1290_v20 = vpop.f32.mrf.mxu1  ;;  %v1303_v22 = vadd.f32 %v1302_v13, %v1289_v19  ;;  %v1277_v23 = vadd.f32 %v1276_v18, %v1263_v21 }
  0xed   :  { %v1317_v26 = vadd.f32 %v1316_v14, %v1303_v22  ;;  %v1291_v28 = vadd.f32 %v1290_v20, %v1277_v23 }
  0xf2   :  { %v1304_v24 = vpop.f32.mrf.mxu2 }
  0xf3   :  { %v1318_v25 = vpop.f32.mrf.mxu3  ;;  %v1305_v31 = vadd.f32 %v1304_v24, %v1291_v28 }
  0xf5   :  { %v1319_v35 = vadd.f32 %v1318_v25, %v1305_v31 }
 0x102   :  { %v1330_v27 = vpop.f32.mrf.mxu0 }
 0x103   :  { %v1331_v29 = vadd.f32 %v1330_v27, %v1317_v26  ;;  %v1344_v30 = vpop.f32.mrf.mxu1 }
 0x105   :  { %v1345_v32 = vadd.f32 %v1344_v30, %v1331_v29 }
 0x10a   :  { %v1358_v33 = vpop.f32.mrf.mxu2  ;;  %v1332_v38 = vpop.f32.mrf.mxu0 }
 0x10b   :  { %v1372_v34 = vpop.f32.mrf.mxu3  ;;  %v1359_v36 = vadd.f32 %v1358_v33, %v1345_v32  ;;  %v1333_v41 = vadd.f32 %v1332_v38, %v1319_v35  ;;  %v1346_v43 = vpop.f32.mrf.mxu1 }
 0x10d   :  { %v1373_v39 = vadd.f32 %v1372_v34, %v1359_v36  ;;  %v1347_v45 = vadd.f32 %v1346_v43, %v1333_v41 }
 0x10f   :  { %v1381_v42 = vmul.f32 %v2119_v37, %v1373_v39 }
 0x111   :  { %v1387_v44 = vadd.f32 %v2120_v40, %v1381_v42 }
 0x112   :  { %v1360_v46 = vpop.f32.mrf.mxu2 }
 0x113   :  { %1389 = vst [vmem:[%s2290_s4] sm:$0xff] %v1387_v44  ;;  %v1361_v47 = vadd.f32 %v1360_v46, %v1347_v45  ;;  %v1374_v48 = vpop.f32.mrf.mxu3 }
 0x115   :  { %v1375_v49 = vadd.f32 %v1374_v48, %v1361_v47 }
 0x117   :  { %v1382_v50 = vmul.f32 %v2119_v37, %v1375_v49 }
 0x119   :  { %v1388_v51 = vadd.f32 %v2120_v40, %v1382_v50 }
 0x11b   :  { %1390 = vst [vmem:[%s2290_s4 + $0x8] sm:$0xff] %v1388_v51 }
 0x11c   :  { %1395 = vsyncpa [#allocation3], 1 }

</bundles_post_ra>
